<compile_context>
chip_gen: v5e
topology: v5e:2x2
jax: 0.10.0
libtpu: 0.0.40
codegen_flags: <defaults>
</compile_context>

<pallas_src>
import math
from functools import partial

import numpy as np
import jax
import jax.numpy as jnp
from jax.experimental import pallas as pl
from jax.experimental.pallas import tpu as pltpu

LEAKY_SLOPE = 0.01      # nn.LeakyReLU default negative_slope
IN_EPS = 1e-5           # InstanceNorm3d eps
BN_EPS = 1e-5           # BatchNorm3d eps
HARRIS_K = 0.04


# -----------------------------------------------------------------------------
# roll-convention probe (so the shifted-window trick is sign-safe)
# -----------------------------------------------------------------------------
def _roll_probe_kernel(x_ref, o_ref):
    o_ref[...] = pltpu.roll(x_ref[...], 1, axis=1)


_ROLL_SIGN = None


def roll_sign():
    """+1 / -1 multiplier so that _shifted(v, off) returns u[:, j] = v[:, j + off]."""
    global _ROLL_SIGN
    if _ROLL_SIGN is None:
        x = jnp.arange(128, dtype=jnp.float32).reshape(1, 128)
        y = pl.pallas_call(
            _roll_probe_kernel,
            out_shape=jax.ShapeDtypeStruct((1, 128), jnp.float32),
        )(x)
        first = float(y[0, 0])
        if first == 127.0:
            _ROLL_SIGN = -1
        elif first == 1.0:
            _ROLL_SIGN = 1
        else:
            raise ValueError(f"unrecognized pltpu.roll convention (probe value {first})")
    return _ROLL_SIGN


def _shifted(v, off, ne, sign):
    """u[:, j] = v[:, j + off] (valid wherever j + off stays in range; callers mask the rest)."""
    if off == 0:
        return v
    return pltpu.roll(v, (sign * off) % ne, axis=1)


# -----------------------------------------------------------------------------
# geometry helpers: padded-volume flattening so 3x3x3 taps are lane shifts
# -----------------------------------------------------------------------------
def _round_up(n, m):
    return ((n + m - 1) // m) * m


def make_geom(D, H, W):
    """Shared per-resolution geometry + interior mask for the flattened padded volume."""
    Dp, Hp, Wp = D + 2, H + 2, W + 2
    Np = Dp * Hp * Wp
    G = Hp * Wp + Wp + 1                       # largest |tap offset| in flattened coords
    Ne = _round_up(Np, 128)                    # lane-aligned flattened length
    # Wrap safety: interior voxels live at flat index j in [G, Np-1-G] and |off| <= G, so
    # j + off stays inside [0, Np) <= [0, Ne): circular rolls can never alias wrapped lanes
    # into the interior outputs we keep.
    assert Ne >= Np and 2 * G < Np
    offs = tuple((kd - 1) * Hp * Wp + (kh - 1) * Wp + (kw - 1)
                 for kd in range(3) for kh in range(3) for kw in range(3))
    m3 = np.zeros((Dp, Hp, Wp), np.float32)
    m3[1:-1, 1:-1, 1:-1] = 1.0
    mflat = np.zeros((1, Ne), np.float32)
    mflat[0, :Np] = m3.reshape(-1)
    geom = dict(D=D, H=H, W=W, Np=Np, Ne=Ne, Wp=Wp, HpWp=Hp * Wp, offs=offs,
                n_valid=D * H * W)
    return geom, jnp.asarray(mflat)


def flatten_volume(x, geom):
    """(B,C,D,H,W) -> (B,C,Ne): zero-pad spatially by 1, flatten, zero-extend to lane multiple."""
    B, C, D, H, W = x.shape
    Np, Ne = geom["Np"], geom["Ne"]
    xp = jnp.pad(x, ((0, 0), (0, 0), (1, 1), (1, 1), (1, 1)))
    flat = xp.reshape(B, C, Np)
    if Ne == Np:
        return flat
    return jnp.pad(flat, ((0, 0), (0, 0), (0, Ne - Np)))


def extract_interior(y_ext, geom):
    """(B,C,Ne) extended-flat -> (B,C,D,H,W) interior voxels."""
    B, C, _ = y_ext.shape
    D, H, W = geom["D"], geom["H"], geom["W"]
    Dp, Hp, Wp = D + 2, H + 2, W + 2
    vol = y_ext[:, :, :Dp * Hp * Wp].reshape(B, C, Dp, Hp, Wp)
    return vol[:, :, 1:-1, 1:-1, 1:-1]


# -----------------------------------------------------------------------------
# 1x1x1 up-projection (hoisted BEFORE the nearest upsample: commutes exactly)
# -----------------------------------------------------------------------------
def _pointwise_kernel(x_ref, w_ref, b_ref, o_ref):
    y = jnp.dot(w_ref[...], x_ref[0].astype(jnp.bfloat16),
                preferred_element_type=jnp.float32)
    o_ref[...] = (y + b_ref[...]).astype(o_ref.dtype)[None]


def up_project(x, w, b):
    """1x1x1 conv.  x: (B, Cin, N), w: (Cin, Cout), b: (Cout,).  Returns bf16 (B, Cout, N)."""
    B, Cin, N = x.shape
    Cout = w.shape[1]
    wT = w.T.astype(jnp.bfloat16)               # (Cout, Cin)
    if N < 512 or N % 128 != 0:
        # Tiny / non-lane-dense GEMM: a dedicated pallas_call is pure launch overhead here.
        y = jnp.einsum("oc,bcn->bon", wT, x.astype(jnp.bfloat16),
                       preferred_element_type=jnp.float32)
        return (y + b.reshape(1, Cout, 1)).astype(jnp.bfloat16)
    return pl.pallas_call(
        _pointwise_kernel,
        out_shape=jax.ShapeDtypeStruct((B, Cout, N), jnp.bfloat16),
        grid=(B,),
        in_specs=[pl.BlockSpec((1, Cin, N), lambda i: (i, 0, 0)),
                  pl.BlockSpec((Cout, Cin), lambda i: (0, 0)),
                  pl.BlockSpec((Cout, 1), lambda i: (0, 0))],
        out_specs=pl.BlockSpec((1, Cout, N), lambda i: (i, 0, 0)),
        compiler_params=pltpu.CompilerParams(dimension_semantics=("parallel",)),
    )(x, wT, b.reshape(Cout, 1))


# -----------------------------------------------------------------------------
# fused BasicResBlock + seg head (one pallas_call per stage)
# -----------------------------------------------------------------------------
def _res_block_kernel(xa_ref, xb_ref, mask_ref, w1_ref, w2_ref, w3_ref, pv_ref,
                      ws_ref, bs_ref, y_ref, seg_ref, st1_ref, st2_ref,
                      *, ne, offs, sign, n_valid, eps, alpha):
    mask = mask_ref[...]                          # (1, Ne): 1 at interior voxels
    inv_n = 1.0 / n_valid
    c_out = y_ref.shape[1]

    # per-channel params packed as (C, 8) = [b1 g1 bt1 b2 g2 bt2 b3 pad]
    pv = pv_ref[...]
    b1, g1, bt1 = pv[:, 0:1], pv[:, 1:2], pv[:, 2:3]
    b2, g2, bt2 = pv[:, 3:4], pv[:, 4:5], pv[:, 5:6]
    b3 = pv[:, 6:7]

    # concat the two branches once in VMEM (f32, sublane-aligned), cast to bf16 ONCE
    x = jnp.concatenate([xa_ref[0].astype(jnp.float32),
                         xb_ref[0].astype(jnp.float32)], axis=0)    # (Cin, Ne)
    xb16 = x.astype(jnp.bfloat16)
    cin = x.shape[0]

    def instnorm(acc, g, bt):
        mean = jnp.sum(acc * mask, axis=1, keepdims=True) * inv_n
        cen = acc - mean
        var = jnp.sum(cen * cen * mask, axis=1, keepdims=True) * inv_n
        return cen * jax.lax.rsqrt(var + eps) * g + bt

    # ---- conv1: all 27 taps stacked on the contraction axis -> ONE GEMM, K = 27*Cin ----------
    for t, off in enumerate(offs):
        st1_ref[pl.ds(t * cin, cin), :] = _shifted(xb16, off, ne, sign)
    acc1 = jnp.dot(w1_ref[...], st1_ref[...], preferred_element_type=jnp.float32) + b1
    y1 = instnorm(acc1, g1, bt1)
    y1 = jnp.where(y1 >= 0, y1, alpha * y1)
    y1 = y1 * mask                                # zero outside the volume -> conv2 zero padding

    # ---- conv2: same stacked-K GEMM (bf16 staging when C is packing-aligned, else f32) -------
    y1s = y1.astype(st2_ref.dtype)
    for t, off in enumerate(offs):
        st2_ref[pl.ds(t * c_out, c_out), :] = _shifted(y1s, off, ne, sign)
    acc2 = jnp.dot(w2_ref[...], st2_ref[...], preferred_element_type=jnp.float32) + b2
    y2 = instnorm(acc2, g2, bt2)

    # ---- 1x1 shortcut on the block input, residual add, LeakyReLU ----------------------------
    sc = jnp.dot(w3_ref[...], xb16, preferred_element_type=jnp.float32) + b3
    y2 = y2 + sc
    y2 = jnp.where(y2 >= 0, y2, alpha * y2)
    y_ref[...] = y2.astype(y_ref.dtype)[None]

    # ---- fused 1x1 segmentation head ----------------------------------------------------------
    seg = jnp.dot(ws_ref[...], y2.astype(jnp.bfloat16),
                  preferred_element_type=jnp.float32) + bs_ref[...]
    seg_ref[...] = seg[None]


def fused_res_block(xa, xb, mask, geom, rp, w_seg, b_seg):
    """xa: (B,Ca,Ne) upsampled branch, xb: (B,Cb,Ne) skip branch (concat done in VMEM)."""
    B, Ca, Ne = xa.shape
    Cb = xb.shape[1]
    Cin = Ca + Cb
    C = rp["g1"].shape[0]
    nc = w_seg.shape[1]
    # bf16 staging needs the per-tap row block to be packing-aligned (16 rows); fall back to f32
    st2_dtype = jnp.bfloat16 if C % 16 == 0 else jnp.float32

    # stacked conv weights: (Cout, 27*Cin), tap-major / channel-minor along the K axis
    w1s = (rp["w1"].reshape(27, Cin, C).transpose(2, 0, 1)
           .reshape(C, 27 * Cin).astype(jnp.bfloat16))
    w2s = (rp["w2"].reshape(27, C, C).transpose(2, 0, 1)
           .reshape(C, 27 * C).astype(st2_dtype))
    w3s = rp["w3"].T.astype(jnp.bfloat16)         # (C, Cin)
    wsg = w_seg.T.astype(jnp.bfloat16)            # (nc, C)
    pv = jnp.stack([rp["b1"], rp["g1"], rp["bt1"], rp["b2"], rp["g2"], rp["bt2"],
                    rp["b3"], jnp.zeros_like(rp["b1"])], axis=1)     # (C, 8)

    kern = partial(_res_block_kernel, ne=Ne, offs=geom["offs"], sign=roll_sign(),
                   n_valid=float(geom["n_valid"]), eps=IN_EPS, alpha=LEAKY_SLOPE)
    y, seg = pl.pallas_call(
        kern,
        out_shape=(jax.ShapeDtypeStruct((B, C, Ne), jnp.bfloat16),
                   jax.ShapeDtypeStruct((B, nc, Ne), jnp.float32)),
        grid=(B,),
        in_specs=[
            pl.BlockSpec((1, Ca, Ne), lambda b: (b, 0, 0)),
            pl.BlockSpec((1, Cb, Ne), lambda b: (b, 0, 0)),
            pl.BlockSpec((1, Ne), lambda b: (0, 0)),
            pl.BlockSpec((C, 27 * Cin), lambda b: (0, 0)),
            pl.BlockSpec((C, 27 * C), lambda b: (0, 0)),
            pl.BlockSpec((C, Cin), lambda b: (0, 0)),
            pl.BlockSpec((C, 8), lambda b: (0, 0)),
            pl.BlockSpec((nc, C), lambda b: (0, 0)),
            pl.BlockSpec((nc, 1), lambda b: (0, 0)),
        ],
        out_specs=(pl.BlockSpec((1, C, Ne), lambda b: (b, 0, 0)),
                   pl.BlockSpec((1, nc, Ne), lambda b: (b, 0, 0))),
        scratch_shapes=[pltpu.VMEM((27 * Cin, Ne), jnp.bfloat16),
                        pltpu.VMEM((27 * C, Ne), st2_dtype)],
        compiler_params=pltpu.CompilerParams(
            dimension_semantics=("parallel",),
            vmem_limit_bytes=48 * 1024 * 1024),
    )(xa, xb, mask, w1s, w2s, w3s, pv, wsg, b_seg.reshape(nc, 1))
    return y, seg


# -----------------------------------------------------------------------------
# fused EdgeEnhancement scoring (shared rolls + separable box filters)
# -----------------------------------------------------------------------------
def _edge_scores_kernel(xe_ref, mask_ref, ph_ref, plap_ref,
                        *, ne, offs, sign, wp, hpwp, k):
    mask = mask_ref[...]                          # (1, Ne)
    x = xe_ref[0]                                 # (C, Ne) f32
    c = x.shape[0]

    # one roll per tap offset feeds Sobel-X/Y/Z and the Laplacian simultaneously
    gx = jnp.zeros((c, ne), jnp.float32)
    gy = jnp.zeros((c, ne), jnp.float32)
    gz = jnp.zeros((c, ne), jnp.float32)
    lap = jnp.zeros((c, ne), jnp.float32)
    for t, off in enumerate(offs):
        tx, ty, tz, tl = _SOBEL_X_T[t], _SOBEL_Y_T[t], _SOBEL_Z_T[t], _LAPLACIAN_T[t]
        if tx == 0.0 and ty == 0.0 and tz == 0.0 and tl == 0.0:
            continue
        xs = _shifted(x, off, ne, sign)

        def acc_into(a, wgt):
            if wgt == 1.0:
                return a + xs
            if wgt == -1.0:
                return a - xs
            return a + wgt * xs

        if tx != 0.0:
            gx = acc_into(gx, tx)
        if ty != 0.0:
            gy = acc_into(gy, ty)
        if tz != 0.0:
            gz = acc_into(gz, tz)
        if tl != 0.0:
            lap = acc_into(lap, tl)

    def box(p):
        # separable 3x3x3 mean: three 1-D [1,1,1] passes (w, h, d) then a single 1/27 scale
        p = p * mask                              # mask => zero padding for the box filter
        for off in (1, wp, hpwp):
            p = p + _shifted(p, off, ne, sign) + _shifted(p, -off, ne, sign)
        return p * (1.0 / 27.0)

    xx = box(gx * gx)
    yy = box(gy * gy)
    zz = box(gz * gz)
    xy = box(gx * gy)
    xz = box(gx * gz)
    yz = box(gy * gz)

    det = (xx * (yy * zz - yz * yz)
           - xy * (xy * zz - yz * xz)
           + xz * (xy * yz - yy * xz))
    tr = xx + yy + zz
    resp = det - k * tr * tr
    ph_ref[...] = jnp.sum(resp * mask, axis=1, keepdims=True)[None]
    plap_ref[...] = jnp.sum(jnp.abs(lap) * mask, axis=1, keepdims=True)[None]


def edge_channel_scores(xe, mask, geom):
    B, C, Ne = xe.shape
    kern = partial(_edge_scores_kernel, ne=Ne, offs=geom["offs"], sign=roll_sign(),
                   wp=geom["Wp"], hpwp=geom["HpWp"], k=HARRIS_K)
    ph, plp = pl.pallas_call(
        kern,
        out_shape=(jax.ShapeDtypeStruct((B, C, 1), jnp.float32),
                   jax.ShapeDtypeStruct((B, C, 1), jnp.float32)),
        grid=(B,),
        in_specs=[pl.BlockSpec((1, C, Ne), lambda b: (b, 0, 0)),
                  pl.BlockSpec((1, Ne), lambda b: (0, 0))],
        out_specs=(pl.BlockSpec((1, C, 1), lambda b: (b, 0, 0)),
                   pl.BlockSpec((1, C, 1), lambda b: (b, 0, 0))),
        compiler_params=pltpu.CompilerParams(dimension_semantics=("parallel",)),
    )(xe, mask)
    return ph[:, :, 0], plp[:, :, 0]


# -----------------------------------------------------------------------------
# BatchNorm3d (training-mode batch stats, default affine) + residual add
# -----------------------------------------------------------------------------
def _batchnorm_add_kernel(x_ref, r_ref, o_ref, *, eps):
    x = x_ref[...]                                # (B, C, N)
    mean = jnp.mean(x, axis=(0, 2), keepdims=True)
    xc = x - mean
    var = jnp.mean(xc * xc, axis=(0, 2), keepdims=True)
    o_ref[...] = xc * jax.lax.rsqrt(var + eps) + r_ref[...]


def batchnorm_add(x, res, eps=BN_EPS):
    # TODO(synk): tile over spatial chunks with two-pass partial-sum stats before running at
    #             realistic volumes (single whole-tensor block is fine at these sizes).
    B, C, D, H, W = x.shape
    xf = x.reshape(B, C, D * H * W)
    rf = res.reshape(B, C, D * H * W)
    spec = pl.BlockSpec((B, C, D * H * W), lambda i: (0, 0, 0))
    out = pl.pallas_call(
        partial(_batchnorm_add_kernel, eps=eps),
        out_shape=jax.ShapeDtypeStruct(xf.shape, jnp.float32),
        grid=(1,),
        in_specs=[spec, spec],
        out_specs=spec,
    )(xf, rf)
    return out.reshape(B, C, D, H, W)


# -----------------------------------------------------------------------------
# fixed edge-detection taps (match the torch constants; kd-major flattening)
# -----------------------------------------------------------------------------
def _taps(a):
    return tuple(float(v) for v in np.asarray(a, np.float32).reshape(-1))


_SOBEL_X_T = _taps([[[-1, 0, 1], [-2, 0, 2], [-1, 0, 1]]] * 3)
_SOBEL_Y_T = _taps([[[-1, -2, -1], [0, 0, 0], [1, 2, 1]]] * 3)
_SOBEL_Z_T = _taps([np.full((3, 3), -1.0), np.zeros((3, 3)), np.full((3, 3), 1.0)])
_LAPLACIAN_T = _taps([[[0, 1, 0], [1, -6, 1], [0, 1, 0]],
                      [[1, -6, 1], [-6, 24, -6], [1, -6, 1]],
                      [[0, 1, 0], [1, -6, 1], [0, 1, 0]]])


# -----------------------------------------------------------------------------
# module-level glue (layout plumbing + data-dependent top-k gather)
# -----------------------------------------------------------------------------
def upsample_nearest(x, factors):
    B, C, D, H, W = x.shape
    fd, fh, fw = factors
    if fd == 1 and fh == 1 and fw == 1:
        return x
    y = jnp.broadcast_to(x[:, :, :, None, :, None, :, None],
                         (B, C, D, fd, H, fh, W, fw))
    return y.reshape(B, C, D * fd, H * fh, W * fw)


def edge_enhancement_plus_skip(x, ratio=0.5):
    """EdgeEnhancement(x) + x  (residual add done here, as in decoder.forward)."""
    B, C, D, H, W = x.shape
    k_sel = int(ratio * C)
    geom, mask = make_geom(D, H, W)
    xe = flatten_volume(x, geom)
    p_harris, p_lap = edge_channel_scores(xe, mask, geom)       # (B, C) each
    # data-dependent top-k channel selection + gather stays in plain JAX
    _, idx_h = jax.lax.top_k(p_harris, k_sel)
    _, idx_l = jax.lax.top_k(p_lap, k_sel)
    gather = jax.vmap(lambda xb_, ib: xb_[ib])
    combined = jnp.concatenate([gather(x, idx_h), gather(x, idx_l)], axis=1)
    # TODO(synk): BatchNorm3d uses training-mode batch statistics (fresh torch module defaults
    #             to train()); eval-mode running stats would be a near-identity rescale.
    return batchnorm_add(combined, x)


def unet_res_decoder_forward(skips, params, strides, deep_supervision=True):
    skips = list(skips)                           # NCDHW throughout
    lres = skips[-1]
    seg_outputs = []
    n_stages = len(params["stages"])
    for s in range(n_stages):
        st = params["stages"][s]
        # UpsampleLayer with the 1x1 conv hoisted before the nearest upsample (commutes exactly)
        B, Cb_, d, h, w = lres.shape
        c_skip = st["w_up"].shape[1]
        xlow = up_project(lres.reshape(B, Cb_, d * h * w), st["w_up"], st["b_up"])
        x = upsample_nearest(xlow.reshape(B, c_skip, d, h, w), strides[-(s + 1)])
        if s == 1 or s == 2:
            skips[-(s + 2)] = edge_enhancement_plus_skip(skips[-(s + 2)])
        skip = skips[-(s + 2)]
        # the (upsampled, skip) concat happens inside the fused kernel -> no extra HBM tensor
        geom, mask = make_geom(*x.shape[2:])
        xa = flatten_volume(x, geom)
        xbf = flatten_volume(skip, geom)
        # one fused kernel: conv3 -> IN -> LReLU -> conv3 -> IN -> 1x1 shortcut -> LReLU -> seg
        y_ext, seg_ext = fused_res_block(xa, xbf, mask, geom, st["res"],
                                         st["w_seg"], st["b_seg"])
        x = extract_interior(y_ext, geom)
        if deep_supervision or s == n_stages - 1:
            seg_outputs.append(extract_interior(seg_ext, geom))
        lres = x
    seg_outputs = seg_outputs[::-1]
    return seg_outputs if deep_supervision else seg_outputs[0]


# -----------------------------------------------------------------------------
# deterministic parameter init (shapes dictated by the module's __init__)
# -----------------------------------------------------------------------------
def init_params(key, output_channels, num_classes):
    n = len(output_channels)
    stages = []

    def w_init(k, shape):
        fan_in = int(np.prod(shape[:-1]))
        return jax.random.normal(k, shape, jnp.float32) / math.sqrt(fan_in)

    def b_init(k, c):
        return 0.01 * jax.random.normal(k, (c,), jnp.float32)

    for s in range(1, n):
        c_below = output_channels[-s]
        c_skip = output_channels[-(s + 1)]
        ks = jax.random.split(jax.random.fold_in(key, s), 10)
        stages.append({
            "w_up": w_init(ks[0], (c_below, c_skip)),
            "b_up": b_init(ks[1], c_skip),
            "res": {
                "w1": w_init(ks[2], (3, 3, 3, 2 * c_skip, c_skip)),
                "b1": b_init(ks[3], c_skip),
                "g1": jnp.ones((c_skip,), jnp.float32),
                "bt1": jnp.zeros((c_skip,), jnp.float32),
                "w2": w_init(ks[4], (3, 3, 3, c_skip, c_skip)),
                "b2": b_init(ks[5], c_skip),
                "g2": jnp.ones((c_skip,), jnp.float32),
                "bt2": jnp.zeros((c_skip,), jnp.float32),
                "w3": w_init(ks[6], (2 * c_skip, c_skip)),
                "b3": b_init(ks[7], c_skip),
            },
            "w_seg": w_init(ks[8], (c_skip, num_classes)),
            "b_seg": b_init(ks[9], num_classes),
        })
    return {"stages": stages}


# -----------------------------------------------------------------------------
if __name__ == "__main__":
    B = 2
    base = 16
    num_classes = 3
    output_channels = (8, 16, 32, 64)
    strides = ((1, 1, 1), (2, 2, 2), (2, 2, 2), (2, 2, 2))

    key = jax.random.PRNGKey(0)
    skips = []
    cur = [base, base, base]
    for st, ch in zip(strides, output_channels):
        cur = [c // f for c, f in zip(cur, st)]
        key, sub = jax.random.split(key)
        skips.append(jax.random.normal(sub, (B, ch, *cur), jnp.float32))
    # skips (NCDHW): (2,8,16,16,16), (2,16,8,8,8), (2,32,4,4,4), (2,64,2,2,2)

    params = init_params(jax.random.PRNGKey(42), output_channels, num_classes)

    outs = unet_res_decoder_forward(skips, params, strides, deep_supervision=True)
    outs = jax.block_until_ready(outs)

    expected = [(B, num_classes, 16, 16, 16),
                (B, num_classes, 8, 8, 8),
                (B, num_classes, 4, 4, 4)]
    assert [tuple(o.shape) for o in outs] == expected, [o.shape for o in outs]
    assert all(bool(jnp.all(jnp.isfinite(o))) for o in outs)
    print("KERNEL_OK")
</pallas_src>

<mosaic_0001>
module attributes {stable_mosaic.version = 11 : i64} {
  func.func @_roll_probe_kernel(%arg0: memref<1x128xf32, #tpu.memory_space<vmem>>, %arg1: memref<1x128xf32, #tpu.memory_space<vmem>>) attributes {dimension_semantics = [], scalar_prefetch = 0 : i64, scratch_operands = 0 : i64, tpu.core_type = #tpu.core_type<tc>} {
    %c0 = arith.constant 0 : index
    %c0_0 = arith.constant 0 : index
    %0 = vector.load %arg0[%c0, %c0_0] : memref<1x128xf32, #tpu.memory_space<vmem>>, vector<1x128xf32>
    %c1_i32 = arith.constant 1 : i32
    %1 = tpu.dynamic_rotate %0 by %c1_i32 dim 1 : vector<1x128xf32>, i32 -> vector<1x128xf32>
    %c0_1 = arith.constant 0 : index
    %c0_2 = arith.constant 0 : index
    %2 = vector.load %arg1[%c0_1, %c0_2] : memref<1x128xf32, #tpu.memory_space<vmem>>, vector<1x128xf32>
    tpu.vector_store %arg1[%c0_1, %c0_2], %1 {strides = array<i32>} : memref<1x128xf32, #tpu.memory_space<vmem>>, vector<1x128xf32>,
    return
  }
}

</mosaic_0001>

<bundles_post_ra>
// kernel: tpu_custom_call.1
= control target key start
LH: loop header
LB: loop body
LE: loop exit
PB: predicated region body
PF: predicated region fallthrough
CT: control target
= control target key end

     0   :  { %6 = vsyncpa [#allocation3], 0  ;;  %s118_s0 = inlined_call_operand.hbm [shape: f32[1,128], index: 0, kind: input, shape index: {}]   ;;  %s119_s1 = inlined_call_operand.hbm [shape: f32[1,128], index: 1, kind: output, shape index: {}]  }
   0x1   :  { %7 = vsyncpa [#allocation4], 0  ;;  %s13_s8 = sshll.u32 %s118_s0, 4  ;;  %s99_s9 = smov [#allocation2]   ;;  %s14_s8 = int_to_ptr.hbm [resolvable:$true] %s13_s8 }
   0x2   :  { %s15_s10 = sshll.u32 %s99_s9, 4  ;;  %s16_s10 = int_to_ptr.vmem [resolvable:$true] %s15_s10 }
   0x3   :  { %18 = dma.hbm_to_vmem [thread:$0]  %s14_s8, 16, %s16_s10, [#allocation3]  }
   0x4   :  { %95 = dma.done.wait [#allocation3], 16  }
   0x5   :  { %96 = vsyncadd [#allocation3], 4294967280  ;;  %v23_v0 = vld [vmem:[#allocation2] sm:$0x1]  ;;  %s100_s11 = smov 1   ;;  %s101_s12 = smov [#allocation5]  }
   0x6   :  { %24 = vrot.lane.b32.xlu0 %v23_v0, %s100_s11  ;;  %s32_s13 = sshll.u32 %s101_s12, 4  ;;  %s34_s16 = sshll.u32 %s119_s1, 4  ;;  %s33_s13 = int_to_ptr.vmem [resolvable:$true] %s32_s13  ;;  %s35_s16 = int_to_ptr.hbm [resolvable:$true] %s34_s16 }
  0x78   :  { %v25_v1 = vpop.permute.xlu0 %24 }
  0x79   :  { %26 = vst [vmem:[#allocation5] sm:$0x1] %v25_v1 }
  0x7a   :  { %37 = dma.vmem_to_hbm [thread:$0]  %s33_s13, 16, %s35_s16, [#allocation4]  }
  0x7b   :  { %97 = dma.done.wait [#allocation4], 16  }
  0x7c   :  { %98 = vsyncadd [#allocation4], 4294967280 }
  0x7d   :  { %42 = vsyncpa [#allocation3], 1 }
  0x7e   :  { %43 = vsyncpa [#allocation4], 1 }

</bundles_post_ra>
